<compile_context>
chip_gen: v5e
topology: v5e:2x2
jax: 0.10.0
libtpu: 0.0.40
codegen_flags: <defaults>
</compile_context>

<pallas_src>
import functools

import jax
import jax.numpy as jnp
from jax.experimental import pallas as pl
from jax.experimental.pallas import tpu as pltpu

_LANE = 128


def _round_up(a: int, m: int) -> int:
    return ((a + m - 1) // m) * m


@functools.lru_cache(maxsize=1)
def _chip_config():
    """Best-effort chip query -> (target_block_bytes, vmem_limit_bytes, multi_tc).

    Every fallback is safe on every TPU generation if the query fails."""
    vmem_cap = None
    multi_tc = False
    try:
        info = pltpu.get_tpu_info()
        vmem_cap = int(getattr(info, "vmem_capacity_bytes", 0)) or None
        for attr in ("num_tensorcores", "tensorcore_count", "num_cores"):
            cores = getattr(info, attr, None)
            if cores is not None and int(cores) > 1:
                multi_tc = True
                break
    except Exception:
        pass
    try:
        if "v7" in jax.devices()[0].device_kind.lower():
            multi_tc = True  # v7x: 2 TensorCores per chip share the parallel grid
    except Exception:
        pass
    if vmem_cap is not None and vmem_cap >= (100 << 20):
        # v5e / v6e: 128 MiB physical VMEM.  12 MiB blocks; live VMEM is
        # 4 x block (in+out, double-buffered) = 48 MiB < 64 MiB limit.
        return 12 << 20, 64 << 20, multi_tc
    # v7x (64 MiB VMEM per TC) or unknown chip: 8 MiB blocks -> 32 MiB live,
    # under an explicit 40 MiB limit (also above v5e's 16 MiB scoped default).
    return 8 << 20, 40 << 20, multi_tc


def _exp_kernel(x_ref, o_ref):
    # exp lowers to the EUP, which has its own VLIW slot and never binds here
    # (HBM DMA does).  Sub-32-bit floats are upcast to f32 for the
    # transcendental -- free in the DMA-bound regime -- and cast back on store.
    o_ref[...] = jnp.exp(x_ref[...].astype(jnp.float32)).astype(o_ref.dtype)


def _pick_block(total: int, max_block: int, mult: int, multi_tc: bool) -> int:
    """Block size along the blocked axis: a multiple of `mult` (or the full
    axis), at most ~max_block, and -- on multi-TensorCore chips -- an even,
    near-balanced number of grid steps so both cores stream."""
    steps = pl.cdiv(total, max_block)
    if multi_tc and total > mult:
        steps = max(steps, 2)
        if steps % 2:
            steps += 1
    if steps <= 1:
        return total  # a full-axis block is always a legal tiling
    return _round_up(pl.cdiv(total, steps), mult)


def exp_pallas(x: jax.Array, *, target_block_bytes=None, vmem_limit_bytes=None):
    """Compute exp(x) with a Pallas TPU kernel (any shape; ints promote to f32)."""
    orig_shape = x.shape
    # torch.exp promotes integer/bool inputs to the default float dtype.
    if not jnp.issubdtype(x.dtype, jnp.floating):
        x = x.astype(jnp.float32)
    dtype = x.dtype
    n = x.size
    if n == 0:
        return jnp.exp(x)

    blk_default, vmem_default, multi_tc = _chip_config()
    if target_block_bytes is None:
        target_block_bytes = blk_default
    if vmem_limit_bytes is None:
        # in+out, each double-buffered = 4 x block live, plus headroom.
        vmem_limit_bytes = max(vmem_default, 4 * target_block_bytes + (8 << 20))

    itemsize = jnp.dtype(dtype).itemsize
    compiler_params = pltpu.CompilerParams(
        dimension_semantics=("parallel",),
        vmem_limit_bytes=vmem_limit_bytes,
    )
    cost = pl.CostEstimate(flops=0, transcendentals=n,
                           bytes_accessed=2 * n * itemsize)

    x_flat = x.reshape(-1)  # metadata-only for a contiguous array

    if n % _LANE == 0:
        # Fast path: lane-dense (rows, 128) slab -> every (8,128) vreg store is
        # a full, unmasked vst.  No padding, no post-kernel slice.
        rows = n // _LANE
        # sublane packing multiple: 8 (f32) / 16 (bf16) / 32 (int8/fp8)
        sub_mult = 8 * max(1, 4 // itemsize)
        max_block_rows = max(
            sub_mult,
            (target_block_bytes // (_LANE * itemsize)) // sub_mult * sub_mult,
        )
        block_rows = _pick_block(rows, max_block_rows, sub_mult, multi_tc)
        out = pl.pallas_call(
            _exp_kernel,
            out_shape=jax.ShapeDtypeStruct((rows, _LANE), dtype),
            grid_spec=pltpu.PrefetchScalarGridSpec(
                num_scalar_prefetch=0,
                grid=(pl.cdiv(rows, block_rows),),
                in_specs=[pl.BlockSpec((block_rows, _LANE), lambda i: (i, 0))],
                out_specs=pl.BlockSpec((block_rows, _LANE), lambda i: (i, 0)),
            ),
            compiler_params=compiler_params,
            cost_estimate=cost,
        )(x_flat.reshape(rows, _LANE))
    else:
        # Ragged path (n % 128 != 0): keep the array 1-D and let Pallas mask
        # the ragged last block's store in-kernel.  Replaces the old jnp.pad
        # (a full extra HBM read+write) + post-kernel prefix-slice copy.
        # exp of the stale tail of the last block is harmless: it is dropped
        # on writeback and nothing reduces over the block.
        elem_mult = _LANE * 8 * max(1, 4 // itemsize)  # one (8,128) tile of elems
        max_block = max(
            elem_mult,
            (target_block_bytes // itemsize) // elem_mult * elem_mult,
        )
        block = _pick_block(n, max_block, elem_mult, multi_tc)
        out = pl.pallas_call(
            _exp_kernel,
            out_shape=jax.ShapeDtypeStruct((n,), dtype),
            grid_spec=pltpu.PrefetchScalarGridSpec(
                num_scalar_prefetch=0,
                grid=(pl.cdiv(n, block),),
                in_specs=[pl.BlockSpec((block,), lambda i: (i,))],
                out_specs=pl.BlockSpec((block,), lambda i: (i,)),
            ),
            compiler_params=compiler_params,
            cost_estimate=cost,
        )(x_flat)

    return out.reshape(orig_shape)


if __name__ == "__main__":
    key = jax.random.PRNGKey(0)

    # Typical small activation tensor (B, C, H, W): lane-aligned 2-D fast path.
    x = jax.random.normal(key, (2, 4, 16, 16), dtype=jnp.float32)
    y = exp_pallas(x)
    jax.block_until_ready(y)
    assert y.shape == x.shape and y.dtype == x.dtype
    assert jnp.allclose(y, jnp.exp(x), rtol=1e-6, atol=1e-6)

    # Ragged size (n not a multiple of 128): 1-D masked-tail path, no padding.
    x2 = jax.random.normal(jax.random.PRNGKey(0), (7, 33), dtype=jnp.float32)
    y2 = exp_pallas(x2)
    jax.block_until_ready(y2)
    assert y2.shape == x2.shape and y2.dtype == x2.dtype
    assert jnp.allclose(y2, jnp.exp(x2), rtol=1e-6, atol=1e-6)

    # Native bf16 path (bf16 HBM traffic, f32 compute inside the kernel).
    x3 = jax.random.normal(jax.random.PRNGKey(0), (2, 8, 64), dtype=jnp.bfloat16)
    y3 = exp_pallas(x3)
    jax.block_until_ready(y3)
    assert y3.shape == x3.shape and y3.dtype == x3.dtype
    assert jnp.allclose(
        y3.astype(jnp.float32), jnp.exp(x3.astype(jnp.float32)), rtol=2e-2, atol=2e-2
    )

    # Integer input: torch.exp promotes to float32.
    x4 = jax.random.randint(jax.random.PRNGKey(0), (4, 8), -3, 4, dtype=jnp.int32)
    y4 = exp_pallas(x4)
    jax.block_until_ready(y4)
    assert y4.shape == x4.shape and y4.dtype == jnp.float32
    assert jnp.allclose(y4, jnp.exp(x4.astype(jnp.float32)), rtol=1e-6, atol=1e-6)

    print("KERNEL_OK")
</pallas_src>

<mosaic_0001>
module attributes {stable_mosaic.version = 11 : i64} {
  func.func @_exp_kernel(%arg0: i32, %arg1: memref<16x128xf32, #tpu.memory_space<vmem>>, %arg2: memref<16x128xf32, #tpu.memory_space<vmem>>) attributes {dimension_semantics = [#tpu.dimension_semantics<parallel>], iteration_bounds = array<i64: 1>, scalar_prefetch = 0 : i64, scratch_operands = 0 : i64, tpu.core_type = #tpu.core_type<tc>, window_params = [{transform_indices = @transform_0, window_bounds = array<i64: 16, 128>}, {transform_indices = @transform_1, window_bounds = array<i64: 16, 128>}]} {
    %c0 = arith.constant 0 : index
    %c0_0 = arith.constant 0 : index
    %0 = vector.load %arg1[%c0, %c0_0] : memref<16x128xf32, #tpu.memory_space<vmem>>, vector<16x128xf32>
    %1 = math.exp %0 : vector<16x128xf32>
    %c0_1 = arith.constant 0 : index
    %c0_2 = arith.constant 0 : index
    %2 = vector.load %arg2[%c0_1, %c0_2] : memref<16x128xf32, #tpu.memory_space<vmem>>, vector<16x128xf32>
    tpu.vector_store %arg2[%c0_1, %c0_2], %1 {strides = array<i32>} : memref<16x128xf32, #tpu.memory_space<vmem>>, vector<16x128xf32>,
    return
  }
  func.func @transform_0(%arg0: i32) -> (i32, i32) {
    %c0_i32 = arith.constant 0 : i32
    %c0_i32_0 = arith.constant 0 : i32
    return %arg0, %c0_i32 : i32, i32
  }
  func.func @transform_1(%arg0: i32) -> (i32, i32) {
    %c0_i32 = arith.constant 0 : i32
    %c0_i32_0 = arith.constant 0 : i32
    return %arg0, %c0_i32 : i32, i32
  }
}

</mosaic_0001>

<bundles_post_ra>
// kernel: tpu_custom_call.1
= control target key start
LH: loop header
LB: loop body
LE: loop exit
PB: predicated region body
PF: predicated region fallthrough
CT: control target
= control target key end

     0   :  { %6 = vsyncpa [#allocation3], 0  ;;  %s132_s0 = inlined_call_operand.hbm [shape: f32[16,128], index: 0, kind: input, shape index: {}]   ;;  %s133_s1 = inlined_call_operand.hbm [shape: f32[16,128], index: 1, kind: output, shape index: {}]  }
   0x1   :  { %7 = vsyncpa [#allocation4], 0  ;;  %s12_s8 = sshll.u32 %s132_s0, 4  ;;  %s112_s9 = smov [#allocation2]   ;;  %s13_s8 = int_to_ptr.hbm [resolvable:$true] %s12_s8 }
   0x2   :  { %s14_s10 = sshll.u32 %s112_s9, 4  ;;  %s113_s11 = smov 128   ;;  %s15_s10 = int_to_ptr.vmem [resolvable:$true] %s14_s10 }
   0x3   :  { %s114_s12 = smov 8  }
   0x4   :  { %20 = dma.hbm_to_vmem [thread:$0]  %s13_s8, 256, %s15_s10, [#allocation3], %s113_s11, %s113_s11, %s114_s12  }
   0x5   :  { %108 = dma.done.wait [#allocation3], 256  }
   0x6   :  { %109 = vsyncadd [#allocation3], 4294967040  ;;  %v25_v0 = vld [vmem:[#allocation2] sm:$0xff]  ;;  %v26_v1 = vld [vmem:[#allocation2 + $0x8] sm:$0xff]  ;;  %s115_s13 = smov [#allocation5]   ;;  %s39_s0 = sshll.u32 %s133_s1, 4  ;;  %s40_s0 = int_to_ptr.hbm [resolvable:$true] %s39_s0 }
   0x7   :  { %v27_v2 = vmul.f32 1.442695, %v25_v0  ;;  %v29_v3 = vmul.f32 1.442695, %v26_v1  ;;  %s37_s14 = sshll.u32 %s115_s13, 4  ;;  %s38_s14 = int_to_ptr.vmem [resolvable:$true] %s37_s14 }
   0x9   :  { %56 = vpow2.f32 %v27_v2 }
   0xa   :  { %58 = vpow2.f32 %v29_v3 }
   0xf   :  { %v57_v4 = vpop.eup %56 }
  0x10   :  { %v59_v5 = vpop.eup %58  ;;  %31 = vst [vmem:[#allocation5] sm:$0xff] %v57_v4 }
  0x11   :  { %32 = vst [vmem:[#allocation5 + $0x8] sm:$0xff] %v59_v5 }
  0x12   :  { %45 = dma.vmem_to_hbm [thread:$0]  %s38_s14, 256, %s40_s0, [#allocation4], %s113_s11, %s113_s11, %s114_s12  }
  0x13   :  { %110 = dma.done.wait [#allocation4], 256  }
  0x14   :  { %111 = vsyncadd [#allocation4], 4294967040 }
  0x15   :  { %50 = vsyncpa [#allocation3], 1 }
  0x16   :  { %51 = vsyncpa [#allocation4], 1 }

</bundles_post_ra>
